<compile_context>
chip_gen: v7x
topology: tpu7x:2x2x1
jax: 0.10.0
libtpu: 0.0.40
codegen_flags: <defaults>
</compile_context>

<pallas_src>
import functools

import jax
import jax.numpy as jnp
from jax.experimental import pallas as pl
from jax.experimental.pallas import tpu as pltpu


def _round_up(a, b):
    return (a + b - 1) // b * b


def _budgets():
    """(per-step slab budget, vmem_limit cap), generation-aware."""
    try:
        cap = int(pltpu.get_tpu_info().vmem_capacity_bytes)
    except Exception:
        cap = 64 << 20                      # conservative (v7x per-TC VMEM)
    if cap >= (96 << 20):                   # v5e / v6e: 128 MiB physical VMEM
        return 14 << 20, 96 << 20
    return 7 << 20, 44 << 20                # v7x: 64 MiB per TensorCore


# ----------------------------------------------------------------------------
# Fused path: one grid step == Nb batch elements, full (C, HW) extent.
# ----------------------------------------------------------------------------
def _se_fused_kernel(x_ref, w1t_ref, b1_ref, w2t_ref, b2_ref, o_ref, *, inv_hw):
    # Global average pool in f32 over the lane (HW) axis: (Nb, C, HW) -> (Nb, C).
    pooled = jnp.sum(x_ref[...].astype(jnp.float32), axis=2) * inv_hw

    # Gate MLP, row-major and batched over the Nb block rows.
    h = jnp.dot(pooled, w1t_ref[...],
                preferred_element_type=jnp.float32) + b1_ref[...]      # (Nb, mid)
    h = h * jax.nn.sigmoid(h)                                          # SiLU
    g = jax.nn.sigmoid(
        jnp.dot(h, w2t_ref[...],
                preferred_element_type=jnp.float32) + b2_ref[...])     # (Nb, C)

    # Single vectorized broadcast multiply; gate cast once to the stream dtype.
    o_ref[...] = x_ref[...] * g.astype(o_ref.dtype)[:, :, None]


def _se_fused(x_flat, w1, b1, w2, b2, *, inv_hw, budget, vmem_cap):
    N, C, HW = x_flat.shape
    mid = w1.shape[0]
    itemsize = jnp.dtype(x_flat.dtype).itemsize
    block_one = C * HW * itemsize               # one batch element's slab

    nb = int(max(1, min(N, budget // block_one)))
    # Prefer >= 4 grid steps (>= 2 per v7x TensorCore, enables step-to-step DMA
    # overlap) as long as each slab stays >= ~1 MiB.
    while nb > 1 and pl.cdiv(N, nb) < 4 and ((nb + 1) // 2) * block_one >= (1 << 20):
        nb = (nb + 1) // 2
    grid = (pl.cdiv(N, nb),)                    # partial edge block is masked by Pallas

    # Row-major weights/biases so the gate MLP is (Nb,C) -> (Nb,mid) -> (Nb,C).
    w1t = jnp.transpose(w1)                     # (C, mid)
    w2t = jnp.transpose(w2)                     # (mid, C)
    b1r = b1.reshape(1, mid)
    b2r = b2.reshape(1, C)

    block_bytes = nb * block_one
    weight_bytes = (w1t.size + w2t.size + b1r.size + b2r.size) * 4
    f32_temp = nb * C * HW * 4                  # pooling temporary (counted!)
    vmem_need = 4 * block_bytes + f32_temp + 2 * weight_bytes + (2 << 20)
    vmem_limit = int(min(vmem_cap, max(16 << 20, vmem_need)))

    cost = pl.CostEstimate(
        flops=int(2 * N * C * HW + 4 * N * C * mid),
        transcendentals=int(N * (2 * mid + C)),
        bytes_accessed=int(2 * N * C * HW * itemsize + weight_bytes),
    )

    return pl.pallas_call(
        functools.partial(_se_fused_kernel, inv_hw=inv_hw),
        out_shape=jax.ShapeDtypeStruct((N, C, HW), x_flat.dtype),
        grid_spec=pltpu.PrefetchScalarGridSpec(
            num_scalar_prefetch=0,
            grid=grid,
            in_specs=[
                pl.BlockSpec((nb, C, HW), lambda n: (n, 0, 0)),   # x
                pl.BlockSpec((C, mid), lambda n: (0, 0)),         # w1^T
                pl.BlockSpec((1, mid), lambda n: (0, 0)),         # b1
                pl.BlockSpec((mid, C), lambda n: (0, 0)),         # w2^T
                pl.BlockSpec((1, C), lambda n: (0, 0)),           # b2
            ],
            out_specs=pl.BlockSpec((nb, C, HW), lambda n: (n, 0, 0)),
        ),
        compiler_params=pltpu.CompilerParams(
            dimension_semantics=("parallel",),
            vmem_limit_bytes=vmem_limit),
        cost_estimate=cost,
    )(x_flat, w1t, b1r, w2t, b2r)


# ----------------------------------------------------------------------------
# Two-pass path: HW-tiled pooled-sum reduction, then HW-tiled x*g stream.
# Used when a single (C, HW) slab would exceed the per-step slab budget.
# ----------------------------------------------------------------------------
def _se_pool_kernel(x_ref, sum_ref, *, hw, thw, need_mask):
    t = pl.program_id(1)

    @pl.when(t == 0)
    def _():
        sum_ref[...] = jnp.zeros_like(sum_ref)

    x = x_ref[...].astype(jnp.float32)                          # (C, thw)
    if need_mask:
        # Partial last tile: zero the out-of-range lanes (OOB reads are garbage).
        lane = jax.lax.broadcasted_iota(jnp.int32, x.shape, 1) + t * thw
        x = jnp.where(lane < hw, x, 0.0)
    sum_ref[...] += jnp.sum(x, axis=1, keepdims=True)           # (C, 1) f32


def _se_scale_kernel(g_ref, x_ref, o_ref):
    # Pure x * g stream; OOB lanes in the partial last tile are dropped on store.
    o_ref[...] = x_ref[...] * g_ref[...]


def _se_two_pass(x_flat, w1, b1, w2, b2, *, inv_hw, budget, vmem_cap):
    N, C, HW = x_flat.shape
    itemsize = jnp.dtype(x_flat.dtype).itemsize

    # HW tile: multiple of 128 lanes whose (C, thw) slab fits the budget.
    max_lanes = max(128, (budget // (C * itemsize)) // 128 * 128)
    thw = int(min(_round_up(HW, 128), max_lanes))
    n_t = pl.cdiv(HW, thw)
    need_mask = (HW % thw) != 0

    block_bytes = C * thw * itemsize
    f32_temp = C * thw * 4
    vmem_limit = int(min(vmem_cap,
                         max(16 << 20, 4 * block_bytes + f32_temp + (2 << 20))))

    # Pass 1: per-(n, c) spatial sums in f32; reduction axis last in the grid.
    sums = pl.pallas_call(
        functools.partial(_se_pool_kernel, hw=HW, thw=thw, need_mask=need_mask),
        out_shape=jax.ShapeDtypeStruct((N, C, 1), jnp.float32),
        grid_spec=pltpu.PrefetchScalarGridSpec(
            num_scalar_prefetch=0,
            grid=(N, n_t),
            in_specs=[pl.BlockSpec((None, C, thw), lambda n, t: (n, 0, t))],
            out_specs=pl.BlockSpec((None, C, 1), lambda n, t: (n, 0, 0)),
        ),
        compiler_params=pltpu.CompilerParams(
            dimension_semantics=("parallel", "arbitrary"),
            vmem_limit_bytes=vmem_limit),
        cost_estimate=pl.CostEstimate(
            flops=int(N * C * HW),
            transcendentals=0,
            bytes_accessed=int(N * C * HW * itemsize + N * C * 4)),
    )(x_flat)

    # Tiny (N, C) gate computed once between the passes in plain JAX.
    pooled = sums[:, :, 0] * inv_hw                              # (N, C) f32
    h = pooled @ w1.T + b1
    h = h * jax.nn.sigmoid(h)                                    # SiLU
    g = jax.nn.sigmoid(h @ w2.T + b2)                            # (N, C)
    g = g.astype(x_flat.dtype).reshape(N, C, 1)

    # Pass 2: pure x * g stream, two inputs per step, both grid axes parallel.
    out = pl.pallas_call(
        _se_scale_kernel,
        out_shape=jax.ShapeDtypeStruct((N, C, HW), x_flat.dtype),
        grid_spec=pltpu.PrefetchScalarGridSpec(
            num_scalar_prefetch=0,
            grid=(N, n_t),
            in_specs=[
                pl.BlockSpec((None, C, 1), lambda n, t: (n, 0, 0)),     # gate
                pl.BlockSpec((None, C, thw), lambda n, t: (n, 0, t)),   # x tile
            ],
            out_specs=pl.BlockSpec((None, C, thw), lambda n, t: (n, 0, t)),
        ),
        compiler_params=pltpu.CompilerParams(
            dimension_semantics=("parallel", "parallel"),
            vmem_limit_bytes=vmem_limit),
        cost_estimate=pl.CostEstimate(
            flops=int(N * C * HW),
            transcendentals=0,
            bytes_accessed=int(2 * N * C * HW * itemsize + N * C * itemsize)),
    )(g, x_flat)
    return out


# ----------------------------------------------------------------------------
# Public wrapper + pure-JAX reference.
# ----------------------------------------------------------------------------
def se_layer(x, w1, b1, w2, b2, *, block_budget_bytes=None):
    """x: (N, C, H, W); w1: (mid, C); b1: (mid,); w2: (C, mid); b2: (C,)."""
    N, C, H, W = x.shape
    HW = H * W
    itemsize = jnp.dtype(x.dtype).itemsize
    x_flat = x.reshape(N, C, HW)
    inv_hw = 1.0 / float(HW)

    slab_budget, vmem_cap = _budgets()
    if block_budget_bytes is not None:
        slab_budget = int(block_budget_bytes)

    if C * HW * itemsize <= slab_budget:
        out = _se_fused(x_flat, w1, b1, w2, b2,
                        inv_hw=inv_hw, budget=slab_budget, vmem_cap=vmem_cap)
    else:
        out = _se_two_pass(x_flat, w1, b1, w2, b2,
                           inv_hw=inv_hw, budget=slab_budget, vmem_cap=vmem_cap)
    return out.reshape(N, C, H, W)


def se_layer_ref(x, w1, b1, w2, b2):
    """Pure-JAX reference matching the PyTorch forward."""
    pooled = jnp.mean(x.astype(jnp.float32), axis=(2, 3))        # (N, C)
    h = pooled @ w1.T + b1                                       # (N, mid)
    h = h * jax.nn.sigmoid(h)                                    # SiLU
    g = jax.nn.sigmoid(h @ w2.T + b2)                            # (N, C)
    return (x.astype(jnp.float32) * g[:, :, None, None]).astype(x.dtype)


if __name__ == "__main__":
    key = jax.random.PRNGKey(0)

    # Module config: SELayer(in_channels=8, squeeze_channels=8, reduction=4) -> mid = 2.
    in_channels, squeeze_channels, reduction = 8, 8, 4
    mid = squeeze_channels // reduction

    kx, k1, k2, k3, k4, kx2 = jax.random.split(key, 6)
    w1 = jax.random.normal(k1, (mid, in_channels), dtype=jnp.float32) * 0.1
    b1 = jax.random.normal(k2, (mid,), dtype=jnp.float32) * 0.1
    w2 = jax.random.normal(k3, (in_channels, mid), dtype=jnp.float32) * 0.1
    b2 = jax.random.normal(k4, (in_channels,), dtype=jnp.float32) * 0.1

    # 1) Canonical small config -> fused path, both batch elements in one block.
    x = jax.random.normal(kx, (2, in_channels, 16, 16), dtype=jnp.float32)
    y = jax.block_until_ready(se_layer(x, w1, b1, w2, b2))
    y_ref = se_layer_ref(x, w1, b1, w2, b2)
    assert y.shape == x.shape and y.dtype == x.dtype
    assert jnp.allclose(y, y_ref, atol=1e-5, rtol=1e-5), "fused path mismatch"

    # 2) Non-128-multiple spatial (14x14 -> HW=196, no padding) and odd batch with a
    #    budget forcing Nb=2 -> grid of 2 with a masked partial edge batch block.
    x2 = jax.random.normal(kx2, (3, in_channels, 14, 14), dtype=jnp.float32)
    y2 = jax.block_until_ready(se_layer(x2, w1, b1, w2, b2, block_budget_bytes=13 * 1024))
    y2_ref = se_layer_ref(x2, w1, b1, w2, b2)
    assert jnp.allclose(y2, y2_ref, atol=1e-5, rtol=1e-5), "partial-block fused path mismatch"

    # 3) Tiny block budget forces the two-pass HW-tiled path (aligned HW).
    y3 = jax.block_until_ready(se_layer(x, w1, b1, w2, b2, block_budget_bytes=4 * 1024))
    assert jnp.allclose(y3, y_ref, atol=1e-5, rtol=1e-5), "two-pass path mismatch"

    # 4) Two-pass path with a partial (masked) last HW tile (196 = 128 + 68).
    y4 = jax.block_until_ready(se_layer(x2, w1, b1, w2, b2, block_budget_bytes=4 * 1024))
    assert jnp.allclose(y4, y2_ref, atol=1e-5, rtol=1e-5), "masked two-pass path mismatch"

    # 5) bf16 end-to-end: pooling/gate in f32, x*g stream + store stay bf16.
    xb = x.astype(jnp.bfloat16)
    yb = jax.block_until_ready(se_layer(xb, w1, b1, w2, b2))
    yb_ref = se_layer_ref(xb, w1, b1, w2, b2)
    assert yb.dtype == jnp.bfloat16
    assert jnp.allclose(yb.astype(jnp.float32), yb_ref.astype(jnp.float32),
                        atol=5e-2, rtol=5e-2), "bf16 path mismatch"

    print("KERNEL_OK")
</pallas_src>

<mosaic_0001>
module attributes {stable_mosaic.version = 11 : i64} {
  func.func @_se_fused_kernel(%arg0: i32, %arg1: memref<2x8x256xf32, #tpu.memory_space<vmem>>, %arg2: memref<8x2xf32, #tpu.memory_space<vmem>>, %arg3: memref<1x2xf32, #tpu.memory_space<vmem>>, %arg4: memref<2x8xf32, #tpu.memory_space<vmem>>, %arg5: memref<1x8xf32, #tpu.memory_space<vmem>>, %arg6: memref<2x8x256xf32, #tpu.memory_space<vmem>>) attributes {dimension_semantics = [#tpu.dimension_semantics<parallel>], iteration_bounds = array<i64: 1>, scalar_prefetch = 0 : i64, scratch_operands = 0 : i64, tpu.core_type = #tpu.core_type<tc>, window_params = [{transform_indices = @transform_0, window_bounds = array<i64: 2, 8, 256>}, {pipeline_mode = #tpu.pipeline_mode<synchronous>, transform_indices = @transform_1, window_bounds = array<i64: 8, 2>}, {pipeline_mode = #tpu.pipeline_mode<synchronous>, transform_indices = @transform_2, window_bounds = array<i64: 1, 2>}, {pipeline_mode = #tpu.pipeline_mode<synchronous>, transform_indices = @transform_3, window_bounds = array<i64: 2, 8>}, {pipeline_mode = #tpu.pipeline_mode<synchronous>, transform_indices = @transform_4, window_bounds = array<i64: 1, 8>}, {transform_indices = @transform_5, window_bounds = array<i64: 2, 8, 256>}]} {
    %c0 = arith.constant 0 : index
    %c0_0 = arith.constant 0 : index
    %c0_1 = arith.constant 0 : index
    %0 = vector.load %arg1[%c0, %c0_0, %c0_1] : memref<2x8x256xf32, #tpu.memory_space<vmem>>, vector<2x8x256xf32>
    %cst = arith.constant dense<0.000000e+00> : vector<2x8xf32>
    %1 = vector.multi_reduction <add>, %0, %cst [2] : vector<2x8x256xf32> to vector<2x8xf32>
    %cst_2 = arith.constant 3.906250e-03 : f32
    %2 = vector.broadcast %cst_2 : f32 to vector<2x8xf32>
    %3 = arith.mulf %1, %2 : vector<2x8xf32>
    %c0_3 = arith.constant 0 : index
    %c0_4 = arith.constant 0 : index
    %4 = vector.load %arg2[%c0_3, %c0_4] : memref<8x2xf32, #tpu.memory_space<vmem>>, vector<8x2xf32>
    %cst_5 = arith.constant dense<0.000000e+00> : vector<2x2xf32>
    %5 = tpu.matmul %3, %4, %cst_5 {dimension_numbers = #tpu.dot_dimension_numbers<[1], [0], [0], [1], [0, 0, 1, 1], [], []>} : vector<2x8xf32>, vector<8x2xf32>, vector<2x2xf32> -> vector<2x2xf32>
    %c0_6 = arith.constant 0 : index
    %c0_7 = arith.constant 0 : index
    %6 = vector.load %arg3[%c0_6, %c0_7] : memref<1x2xf32, #tpu.memory_space<vmem>>, vector<1x2xf32>
    %7 = vector.broadcast %6 : vector<1x2xf32> to vector<2x2xf32>
    %8 = arith.addf %5, %7 : vector<2x2xf32>
    %9 = arith.negf %8 : vector<2x2xf32>
    %10 = math.exp %9 : vector<2x2xf32>
    %cst_8 = arith.constant 1.000000e+00 : f32
    %11 = vector.broadcast %cst_8 : f32 to vector<2x2xf32>
    %12 = arith.addf %11, %10 : vector<2x2xf32>
    %13 = arith.divf %11, %12 : vector<2x2xf32>
    %14 = arith.mulf %8, %13 : vector<2x2xf32>
    %c0_9 = arith.constant 0 : index
    %c0_10 = arith.constant 0 : index
    %15 = vector.load %arg4[%c0_9, %c0_10] : memref<2x8xf32, #tpu.memory_space<vmem>>, vector<2x8xf32>
    %cst_11 = arith.constant dense<0.000000e+00> : vector<2x8xf32>
    %16 = tpu.matmul %14, %15, %cst_11 {dimension_numbers = #tpu.dot_dimension_numbers<[1], [0], [0], [1], [0, 0, 1, 1], [], []>} : vector<2x2xf32>, vector<2x8xf32>, vector<2x8xf32> -> vector<2x8xf32>
    %c0_12 = arith.constant 0 : index
    %c0_13 = arith.constant 0 : index
    %17 = vector.load %arg5[%c0_12, %c0_13] : memref<1x8xf32, #tpu.memory_space<vmem>>, vector<1x8xf32>
    %18 = vector.broadcast %17 : vector<1x8xf32> to vector<2x8xf32>
    %19 = arith.addf %16, %18 : vector<2x8xf32>
    %20 = arith.negf %19 : vector<2x8xf32>
    %21 = math.exp %20 : vector<2x8xf32>
    %cst_14 = arith.constant 1.000000e+00 : f32
    %22 = vector.broadcast %cst_14 : f32 to vector<2x8xf32>
    %23 = arith.addf %22, %21 : vector<2x8xf32>
    %24 = arith.divf %22, %23 : vector<2x8xf32>
    %c0_15 = arith.constant 0 : index
    %c0_16 = arith.constant 0 : index
    %c0_17 = arith.constant 0 : index
    %25 = vector.load %arg1[%c0_15, %c0_16, %c0_17] : memref<2x8x256xf32, #tpu.memory_space<vmem>>, vector<2x8x256xf32>
    %26 = vector.shape_cast %24 : vector<2x8xf32> to vector<2x8x1xf32>
    %27 = vector.broadcast %26 : vector<2x8x1xf32> to vector<2x8x256xf32>
    %28 = arith.mulf %25, %27 : vector<2x8x256xf32>
    %c0_18 = arith.constant 0 : index
    %c0_19 = arith.constant 0 : index
    %c0_20 = arith.constant 0 : index
    %29 = vector.load %arg6[%c0_18, %c0_19, %c0_20] : memref<2x8x256xf32, #tpu.memory_space<vmem>>, vector<2x8x256xf32>
    tpu.vector_store %arg6[%c0_18, %c0_19, %c0_20], %28 {strides = array<i32>} : memref<2x8x256xf32, #tpu.memory_space<vmem>>, vector<2x8x256xf32>,
    return
  }
  func.func @transform_0(%arg0: i32) -> (i32, i32, i32) {
    %c0_i32 = arith.constant 0 : i32
    %c0_i32_0 = arith.constant 0 : i32
    %c0_i32_1 = arith.constant 0 : i32
    return %arg0, %c0_i32, %c0_i32_0 : i32, i32, i32
  }
  func.func @transform_1(%arg0: i32) -> (i32, i32) {
    %c0_i32 = arith.constant 0 : i32
    %c0_i32_0 = arith.constant 0 : i32
    %c0_i32_1 = arith.constant 0 : i32
    return %c0_i32, %c0_i32_0 : i32, i32
  }
  func.func @transform_2(%arg0: i32) -> (i32, i32) {
    %c0_i32 = arith.constant 0 : i32
    %c0_i32_0 = arith.constant 0 : i32
    %c0_i32_1 = arith.constant 0 : i32
    return %c0_i32, %c0_i32_0 : i32, i32
  }
  func.func @transform_3(%arg0: i32) -> (i32, i32) {
    %c0_i32 = arith.constant 0 : i32
    %c0_i32_0 = arith.constant 0 : i32
    %c0_i32_1 = arith.constant 0 : i32
    return %c0_i32, %c0_i32_0 : i32, i32
  }
  func.func @transform_4(%arg0: i32) -> (i32, i32) {
    %c0_i32 = arith.constant 0 : i32
    %c0_i32_0 = arith.constant 0 : i32
    %c0_i32_1 = arith.constant 0 : i32
    return %c0_i32, %c0_i32_0 : i32, i32
  }
  func.func @transform_5(%arg0: i32) -> (i32, i32, i32) {
    %c0_i32 = arith.constant 0 : i32
    %c0_i32_0 = arith.constant 0 : i32
    %c0_i32_1 = arith.constant 0 : i32
    return %arg0, %c0_i32, %c0_i32_0 : i32, i32, i32
  }
}

</mosaic_0001>

<bundles_post_ra>
// kernel: tpu_custom_call.1
= control target key start
LH: loop header
LB: loop body
LE: loop exit
PB: predicated region body
PF: predicated region fallthrough
CT: control target
= control target key end

     0   :  { %10 = vsyncpa [#allocation3], 0  ;;  %s457_s0 = inlined_call_operand.hbm [shape: f32[2,8,256], index: 0, kind: input, shape index: {}]   ;;  %s458_s1 = inlined_call_operand.vmem [shape: f32[8,2], index: 1, kind: input, shape index: {}]   ;;  %s459_s2 = inlined_call_operand.vmem [shape: f32[1,2], index: 2, kind: input, shape index: {}]   ;;  %s460_s3 = inlined_call_operand.vmem [shape: f32[2,8], index: 3, kind: input, shape index: {}]   ;;  %s461_s4 = inlined_call_operand.vmem [shape: f32[1,8], index: 4, kind: input, shape index: {}]   ;;  %s462_s5 = inlined_call_operand.hbm [shape: f32[2,8,256], index: 5, kind: output, shape index: {}]  }
   0x1   :  { %11 = vsyncpa [#allocation4], 0  ;;  %s363_s18 = smov [#allocation2]   ;;  %s315_s22 = scalar_lea.hbm %s457_s0, 512 }
   0x2   :  { %s17_s19 = sshll.u32 %s363_s18, 4  ;;  %p316_p0 = scmp.ne.s32.totalorder %s457_s0, %s315_s22  ;;  %s18_s19 = int_to_ptr.vmem [resolvable:$true] %s17_s19 }
   0x3   :  { %p319_p1 = scmp.lt.u32.totalorder %s315_s22, %s457_s0 }
   0x5   :  { %p321_p2 = pnand %p319_p1, %p316_p0 }
   0x7   :  { %324 = shalt.err (!%p321_p2)
}
   0x8   :  { %s325_s27 = scalar_lea.vmem %s18_s19, 512  ;;  %p330_p4 = scmp.lt.s32.totalorder %s18_s19, %s18_s19 }
   0x9   :  { %p326_p3 = scmp.ne.s32.totalorder %s18_s19, %s325_s27  ;;  %p331_p5 = scmp.lt.s32.totalorder %s325_s27, %s325_s27 }
   0xb   :  { %p332_p6 = por %p331_p5, %p330_p4 }
   0xd   :  { %p333_p7 = pnand %p332_p6, %p326_p3 }
   0xf   :  { %336 = shalt.err (!%p333_p7)
}
  0x10   :  { %s364_s28 = smov 256   ;;  %s365_s29 = smov 16  }
  0x11   :  { %23 = dma.hbm_to_vmem [thread:$0]  %s457_s0, 512, %s18_s19, [#allocation3], %s364_s28, %s364_s28, %s365_s29  }
  0x12   :  { %359 = dma.done.wait [#allocation3], 512  }
  0x13   :  { %360 = vsyncadd [#allocation3], 4294966784  ;;  %v414_v0 = vld [vmem:[#allocation2] sm:$0xff]  ;;  %v416_v1 = vld [vmem:[#allocation2 + $0x8] sm:$0xff]  ;;  %v366_v7 = vmov 0.0   ;;  %vm367_vm0 = vmmov 0   ;;  %v57_v8 = vlaneseq }
  0x14   :  { %v418_v2 = vld [vmem:[#allocation2 + $0x10] sm:$0xff]  ;;  %v39_v3 = vadd.f32 %v416_v1, %v414_v0  ;;  %v422_v4 = vld [vmem:[#allocation2 + $0x18] sm:$0xff]  ;;  %v47_v6 = vld [vmem:[%s458_s1] sm:$0xff]  ;;  %291 = vmatprep.subr.mxu0 %v366_v7  ;;  %293 = vmatprep.mubr.msk.f32.mxu0 %vm367_vm0, %v366_v7  ;;  %vm67_vm1 = vcmask 1041409   ;;  %vm69_vm2 = vcmask 64512   ;;  %vm161_vm3 = vcmask 1041408  }
  0x15   :  { %v42_v5 = vadd.f32 %v422_v4, %v418_v2  ;;  %292 = vmatpush3.msra.mxu0 %v47_v6  ;;  %296 = vmatprep.subr.mxu1 %v366_v7  ;;  %v58_v9 = vand.u32 127, %v57_v8  ;;  %v60_v10 = vshrl.u32 %v57_v8, 7  ;;  %v149_v19 = vld [vmem:[%s460_s3] sm:$0x3]  ;;  %vm157_vm4 = vcmask 15360  }
  0x16   :  { %40 = vadd.xlane.f32.xlu0 %v39_v3  ;;  %298 = vmatprep.mubr.msk.f32.mxu1 %vm367_vm0, %v366_v7  ;;  %v280_v20 = vld [vmem:[%s459_s2] ss:$0 sm:$0xff]  ;;  %s368_s2 = smov [#allocation5]  }
  0x17   :  { %v61_v12 = vsub.s32 %v58_v9, %v60_v10  ;;  %297 = vmatpush3.msk.msra.mxu1 %vm161_vm3, %v149_v19  ;;  %v283_v29 = vld [vmem:[%s461_s4] ss:$0 sm:$0xff]  ;;  %v243_v36 = vsub.s32 0, %v60_v10  ;;  %v250_v39 = vsub.s32 1, %v60_v10  ;;  %s268_s4 = sshll.u32 %s368_s2, 4  ;;  %s269_s4 = int_to_ptr.vmem [resolvable:$true] %s268_s4 }
  0x18   :  { %s337_s12 = scalar_lea.vmem %s269_s4, 512  ;;  %p342_p9 = scmp.lt.s32.totalorder %s269_s4, %s269_s4 }
  0x19   :  { %p338_p8 = scmp.ne.s32.totalorder %s269_s4, %s337_s12  ;;  %p343_p10 = scmp.lt.s32.totalorder %s337_s12, %s337_s12 }
  0x1a   :  { %43 = vadd.xlane.f32.xlu0 %v42_v5 }
  0x1b   :  { %p344_p11 = por %p343_p10, %p342_p9 }
  0x1d   :  { %p345_p12 = pnand %p344_p11, %p338_p8 }
  0xa3   :  { %v41_v11 = vpop.xlane.xlu0 %40 }
  0xa4   :  { %v45_v13 = vmul.f32 0.00390625, %v41_v11 }
  0xa6   :  { %v62_v16 = vrot.slane %v45_v13, %v61_v12 }
  0xa7   :  { %v44_v14 = vpop.xlane.xlu0 %43 }
  0xa8   :  { %v46_v15 = vmul.f32 0.00390625, %v44_v14 }
  0xaa   :  { %v66_v17 = vrot.slane %v46_v15, %v61_v12 }
  0xac   :  { %v68_v18 = vsel %vm67_vm1, %v66_v17, %v62_v16 }
  0xad   :  { %294 = vmatmul.mubr.msk.f32.vlgmr.msra.gmra.mrb[0].mxu0 %vm69_vm2, %v68_v18 }
 0x180   :  { %v138_v21 = vpop.f32.mrb[0].mxu0 }
 0x181   :  { %v139_v22 = vadd.f32 %v280_v20, %v138_v21  ;;  %v295_v23 = vpop.f32.mrb[1].mxu0 }
 0x183   :  { %v282_v24 = vmul.f32 -1.442695, %v139_v22 }
 0x185   :  { %307 = vpow2.f32 %v282_v24 }
 0x18f   :  { %v308_v25 = vpop.eup %307 }
 0x190   :  { %v145_v26 = vadd.f32 1.0, %v308_v25 }
 0x192   :  { %309 = vrcp.f32 %v145_v26 }
 0x19c   :  { %v310_v27 = vpop.eup %309 }
 0x19d   :  { %v148_v28 = vmul.f32 %v310_v27, %v139_v22 }
 0x19f   :  { %299 = vmatmul.mubr.msk.f32.vlgmr.msra.gmra.mrb[0].mxu1 %vm157_vm4, %v148_v28 }
 0x272   :  { %v231_v30 = vpop.f32.mrb[0].mxu1 }
 0x273   :  { %v232_v31 = vadd.f32 %v283_v29, %v231_v30  ;;  %v300_v32 = vpop.f32.mrb[1].mxu1 }
 0x275   :  { %v286_v33 = vmul.f32 -1.442695, %v232_v31 }
 0x277   :  { %311 = vpow2.f32 %v286_v33 }
 0x281   :  { %v312_v34 = vpop.eup %311 }
 0x282   :  { %v238_v35 = vadd.f32 1.0, %v312_v34 }
 0x284   :  { %313 = vrcp.f32 %v238_v35 }
 0x28e   :  { %v314_v37 = vpop.eup %313 }
 0x28f   :  { %v244_v38 = vrot.slane %v314_v37, %v243_v36  ;;  %v251_v40 = vrot.slane %v314_v37, %v250_v39 }
 0x291   :  { %246 = vbcast.lane.b32.xlu1 %v244_v38, 256 }
 0x295   :  { %253 = vbcast.lane.b32.xlu1 %v251_v40, 256 }
 0x303   :  { %v247_v41 = vpop.permute.xlu1 %246 }
 0x304   :  { %v255_v42 = vmul.f32 %v247_v41, %v414_v0  ;;  %v256_v43 = vmul.f32 %v247_v41, %v416_v1 }
 0x306   :  { %259 = vst [vmem:[#allocation5] sm:$0xff] %v255_v42  ;;  %260 = vst [vmem:[#allocation5 + $0x8] sm:$0xff] %v256_v43 }
 0x307   :  { %v254_v44 = vpop.permute.xlu1 %253 }
 0x308   :  { %v257_v45 = vmul.f32 %v254_v44, %v418_v2  ;;  %v258_v46 = vmul.f32 %v254_v44, %v422_v4 }
 0x30a   :  { %261 = vst [vmem:[#allocation5 + $0x10] sm:$0xff] %v257_v45  ;;  %262 = vst [vmem:[#allocation5 + $0x18] sm:$0xff] %v258_v46 }
 0x30b   :  { %348 = shalt.err (!%p345_p12)
}
 0x30c   :  { %s349_s15 = scalar_lea.hbm %s462_s5, 512 }
 0x30d   :  { %p350_p13 = scmp.ne.s32.totalorder %s462_s5, %s349_s15  ;;  %p353_p0 = scmp.lt.u32.totalorder %s349_s15, %s462_s5 }
 0x30f   :  { %p355_p1 = pnand %p353_p0, %p350_p13 }
 0x311   :  { %358 = shalt.err (!%p355_p1)
}
 0x312   :  { %274 = dma.vmem_to_hbm [thread:$0]  %s269_s4, 512, %s462_s5, [#allocation4], %s364_s28, %s364_s28, %s365_s29  }
 0x313   :  { %361 = dma.done.wait [#allocation4], 512  }
 0x314   :  { %362 = vsyncadd [#allocation4], 4294966784 }
 0x315   :  { %278 = vsyncpa [#allocation3], 1 }
 0x316   :  { %279 = vsyncpa [#allocation4], 1 }

</bundles_post_ra>
